<compile_context>
chip_gen: v5e
topology: v5e:2x2
jax: 0.10.0
libtpu: 0.0.40
codegen_flags: <defaults>
</compile_context>

<pallas_src>
import functools
import re

import jax
import jax.numpy as jnp
import numpy as np
from jax.experimental import pallas as pl
from jax.experimental.pallas import tpu as pltpu

# ------------------- synthetic object-centric representation -------------------
N_OBJS = 4
N_FEATS = 8            # [x, y, w, h, c_red, c_green, c_blue, c_yellow]
COLOR_OFFSET = 4
N_COLORS = 4
COLORS = ["red", "green", "blue", "yellow"]
CLOSE_THRESH = 0.5

# ------------------- fused-kernel constants -------------------
PRED_CLOSEBY = 0
PRED_COLOR = 1

LANE = 128
SUBLANE = 8
MAX_LANE_TILE = 8192               # overhead-bound kernel: big batch tiles
VMEM_BUDGET_BYTES = 24 * 1024 * 1024   # double-buffered zs+out blocks under this
SPLIT_THRESHOLD = 1024             # split batch 2-way (v7x dual TC) for big B only


# ------------------- minimal logic-language stand-ins -------------------
class DType:
    def __init__(self, name):
        self.name = name


class Const:
    def __init__(self, name, dtype):
        self.name = name
        self.dtype = dtype


class Predicate:
    def __init__(self, name):
        self.name = name


class Atom:
    def __init__(self, pred, terms):
        self.pred = pred
        self.terms = terms


class Language:
    """Minimal Language: only term_index over object-typed constants."""

    def __init__(self, object_consts):
        self._objects = [c.name for c in object_consts]

    def term_index(self, const):
        return self._objects.index(const.name)


# ------------------- statically-specialized Pallas valuation kernel -------------------
def _make_valuation_kernel(rows, n_atoms_pad):
    """Build a kernel closed over the static atom table.

    rows : tuple of (pred_id, arg0, arg1) Python ints (real atoms only)
    The kernel evaluates ALL atoms for one batch tile:
      zs_ref  : VMEM f32 (N_OBJS, N_FEATS_pad, TB)  - batch on the lane axis
      out_ref : VMEM f32 (n_atoms_pad, TB)
    """
    thresh2 = CLOSE_THRESH * CLOSE_THRESH
    n_atoms = len(rows)
    n_pad = n_atoms_pad - n_atoms

    def kernel(zs_ref, out_ref):
        pair_rows = {}  # trace-time dedup of symmetric closeby pairs
        for a, (pred, a0, a1) in enumerate(rows):
            if pred == PRED_CLOSEBY:
                key = (a0, a1) if a0 <= a1 else (a1, a0)   # distance is symmetric
                if key not in pair_rows:
                    # closeby(i, j): bool2probs(||pos_i - pos_j|| < thresh)
                    pos_i = zs_ref[key[0], 0:2, :]          # (2, TB) static view
                    pos_j = zs_ref[key[1], 0:2, :]
                    d = pos_i - pos_j
                    dist2 = d[0:1, :] * d[0:1, :] + d[1:2, :] * d[1:2, :]
                    pair_rows[key] = jnp.where(dist2 < thresh2, 0.99, 0.01)
                row = pair_rows[key]
            else:  # PRED_COLOR: one-hot contraction == single feature-row copy
                fc = COLOR_OFFSET + a1
                row = zs_ref[a0, fc:fc + 1, :]              # (1, TB) static view
            # Direct static-slice store: bounds live ranges (no concat/pack).
            out_ref[a:a + 1, :] = row.astype(out_ref.dtype)
        if n_pad:
            out_ref[n_atoms:, :] = jnp.zeros((n_pad, out_ref.shape[1]),
                                             out_ref.dtype)

    return kernel


@functools.lru_cache(maxsize=None)
def _build_fused_forward(rows, n_objs, n_feats):
    """Compile (and cache) the fused forward for one fixed atom set."""
    rows = tuple(rows)
    n_atoms = len(rows)
    n_atoms_pad = max(SUBLANE, pl.cdiv(n_atoms, SUBLANE) * SUBLANE)
    n_feats_pad = pl.cdiv(n_feats, SUBLANE) * SUBLANE
    kernel = _make_valuation_kernel(rows, n_atoms_pad)

    @jax.jit
    def fwd(zs):
        b = zs.shape[0]
        # One transpose per observation, amortized over all atoms:
        # (B, N_OBJS, N_FEATS) -> (N_OBJS, N_FEATS, B): batch on the lane axis.
        # TODO(synk): accept zs already in (N_OBJS, N_FEATS, B) layout upstream
        # to drop this wrapper-side copy for very large RL batches.
        zs_t = jnp.transpose(zs, (1, 2, 0)).astype(jnp.float32)

        # Batch tile: largest multiple of 128 under VMEM budget and cap.
        b_pad = pl.cdiv(b, LANE) * LANE
        col_bytes = 4 * (n_objs * n_feats_pad + n_atoms_pad)   # per lane column
        tb_budget = max(LANE, (VMEM_BUDGET_BYTES // (2 * col_bytes)) // LANE * LANE)
        tb = min(b_pad, MAX_LANE_TILE, tb_budget)
        # v7x dual-TC: for big batches make sure the parallel axis has >=2 steps.
        if tb == b_pad and b_pad >= 2 * SPLIT_THRESHOLD:
            tb = pl.cdiv(b_pad // 2, LANE) * LANE
        n_tiles = pl.cdiv(b_pad, tb)
        b_pad = n_tiles * tb

        zs_t = jnp.pad(zs_t, ((0, 0), (0, n_feats_pad - n_feats), (0, b_pad - b)))

        # Scoped-VMEM limit sized from the real double-buffered working set.
        vmem_limit = min(128 * 1024 * 1024,
                         2 * col_bytes * tb + 4 * 1024 * 1024)

        out = pl.pallas_call(
            kernel,
            out_shape=jax.ShapeDtypeStruct((n_atoms_pad, b_pad), jnp.float32),
            grid_spec=pltpu.PrefetchScalarGridSpec(
                num_scalar_prefetch=0,
                grid=(n_tiles,),
                in_specs=[pl.BlockSpec((n_objs, n_feats_pad, tb),
                                       lambda bt: (0, 0, bt))],
                out_specs=pl.BlockSpec((n_atoms_pad, tb), lambda bt: (0, bt)),
            ),
            compiler_params=pltpu.CompilerParams(
                dimension_semantics=("parallel",),
                vmem_limit_bytes=vmem_limit,
            ),
        )(zs_t)
        # Padded batch columns see zs==0 (so closeby would read 0.99); slice off.
        return out[:n_atoms, :b]

    return fwd


# ------------------- ValuationModule -------------------
class ValuationModule:
    """JAX/Pallas re-implementation of the PyTorch ValuationModule forward pass.

    Ground atoms are compiled into the kernel as static (pred, arg0, arg1)
    indices; one cached, fused pallas_call evaluates all atoms per batch tile.
    `forward` keeps the original single-atom semantics; `forward_atoms` is the
    batched fast path.
    """
    PRED_IDS = {"closeby": PRED_CLOSEBY, "color": PRED_COLOR}

    def __init__(self, lang: Language, colors=COLORS):
        self.lang = lang
        self.colors = colors
        # TODO(synk): the real module loads env-specific valuation functions
        # from val_fn_path via inspect; two representative ones are built in.

    def __call__(self, zs, atom):
        return self.forward(zs, atom)

    # --- grounding helpers (mirrors ground_to_tensor / term_to_onehot) ---
    def _term_to_obj_index(self, const):
        result = re.match("obj([1-9][0-9]*)", const.name)
        if result is not None:
            idx = int(result[1]) - 1
        elif const.dtype.name == "object":
            idx = self.lang.term_index(const)
        else:
            raise ValueError(f"Not an object term: {const.name}")
        if not 0 <= idx < N_OBJS:
            raise ValueError(f"Object index out of range: {const.name}")
        return idx

    def _atom_to_row(self, atom):
        name = atom.pred.name
        if name not in self.PRED_IDS:
            raise NotImplementedError(
                f"Missing implementation for valuation function '{name}'.")
        if name == "closeby":
            i = self._term_to_obj_index(atom.terms[0])
            j = self._term_to_obj_index(atom.terms[1])
            return (PRED_CLOSEBY, i, j)
        # color(obj, c): one-hot index fused into the kernel as a feature row
        i = self._term_to_obj_index(atom.terms[0])
        c = self.colors.index(atom.terms[1].name)
        return (PRED_COLOR, i, c)

    # --- fused forward over many atoms: ONE pallas_call ---
    def forward_atoms(self, zs, atoms):
        rows = tuple(self._atom_to_row(a) for a in atoms)
        fwd = _build_fused_forward(rows, N_OBJS, N_FEATS)
        return fwd(zs)                               # (n_atoms, B)

    # --- per-atom API, same semantics as the PyTorch module ---
    def forward(self, zs, atom):
        return self.forward_atoms(zs, [atom])[0]     # (B,)


# ------------------- pure-JAX references -------------------
def _ref_closeby(zs, i, j):
    d = zs[:, i, 0:2] - zs[:, j, 0:2]
    dist2 = jnp.sum(d * d, axis=-1)
    return jnp.where(dist2 < CLOSE_THRESH * CLOSE_THRESH, 0.99, 0.01)


def _ref_color(zs, i, c):
    onehot = jnp.zeros((zs.shape[0], N_COLORS), jnp.float32).at[:, c].set(1.0)
    return jnp.sum(zs[:, i, COLOR_OFFSET:COLOR_OFFSET + N_COLORS] * onehot, axis=-1)


if __name__ == "__main__":
    key = jax.random.PRNGKey(0)
    B = 2
    zs = jax.random.uniform(key, (B, N_OBJS, N_FEATS), dtype=jnp.float32)

    obj_dtype = DType("object")
    color_dtype = DType("color")
    object_consts = [Const(f"obj{k + 1}", obj_dtype) for k in range(N_OBJS)]
    lang = Language(object_consts)
    vm = ValuationModule(lang)

    # A batch of ground atoms: every ordered object pair (closeby) and every
    # (object, color) pair (color) -> 28 atoms, padded to 32 inside the module.
    atoms = []
    for i in range(N_OBJS):
        for j in range(N_OBJS):
            if i != j:
                atoms.append(Atom(Predicate("closeby"),
                                  [object_consts[i], object_consts[j]]))
    for i in range(N_OBJS):
        for cname in COLORS:
            atoms.append(Atom(Predicate("color"),
                              [object_consts[i], Const(cname, color_dtype)]))

    probs = jax.block_until_ready(vm.forward_atoms(zs, atoms))   # (n_atoms, B)
    assert probs.shape == (len(atoms), B)

    # check every atom against the pure-JAX reference
    for a_idx, atom in enumerate(atoms):
        pred_id, a0, a1 = vm._atom_to_row(atom)
        if pred_id == PRED_CLOSEBY:
            ref = _ref_closeby(zs, a0, a1)
        else:
            ref = _ref_color(zs, a0, a1)
        np.testing.assert_allclose(np.asarray(probs[a_idx]), np.asarray(ref),
                                   rtol=1e-5, atol=1e-6)

    # single-atom forward API (original module semantics) still matches
    p_single = jax.block_until_ready(vm(zs, atoms[0]))
    assert p_single.shape == (B,)
    np.testing.assert_allclose(np.asarray(p_single), np.asarray(probs[0]),
                               rtol=1e-5, atol=1e-6)

    print("KERNEL_OK")
</pallas_src>

<mosaic_0001>
module attributes {stable_mosaic.version = 11 : i64} {
  func.func @kernel(%arg0: i32, %arg1: memref<4x8x128xf32, #tpu.memory_space<vmem>>, %arg2: memref<32x128xf32, #tpu.memory_space<vmem>>) attributes {dimension_semantics = [#tpu.dimension_semantics<parallel>], iteration_bounds = array<i64: 1>, scalar_prefetch = 0 : i64, scratch_operands = 0 : i64, tpu.core_type = #tpu.core_type<tc>, window_params = [{transform_indices = @transform_0, window_bounds = array<i64: 4, 8, 128>}, {transform_indices = @transform_1, window_bounds = array<i64: 32, 128>}]} {
    %c0 = arith.constant 0 : index
    %c0_0 = arith.constant 0 : index
    %c0_1 = arith.constant 0 : index
    %0 = vector.load %arg1[%c0, %c0_0, %c0_1] : memref<4x8x128xf32, #tpu.memory_space<vmem>>, vector<1x2x128xf32>
    %1 = vector.shape_cast %0 : vector<1x2x128xf32> to vector<2x128xf32>
    %c1 = arith.constant 1 : index
    %c0_2 = arith.constant 0 : index
    %c0_3 = arith.constant 0 : index
    %2 = vector.load %arg1[%c1, %c0_2, %c0_3] : memref<4x8x128xf32, #tpu.memory_space<vmem>>, vector<1x2x128xf32>
    %3 = vector.shape_cast %2 : vector<1x2x128xf32> to vector<2x128xf32>
    %4 = arith.subf %1, %3 : vector<2x128xf32>
    %5 = vector.extract_strided_slice %4 {offsets = [0, 0], sizes = [1, 128], strides = [1, 1]} : vector<2x128xf32> to vector<1x128xf32>
    %6 = vector.extract_strided_slice %4 {offsets = [0, 0], sizes = [1, 128], strides = [1, 1]} : vector<2x128xf32> to vector<1x128xf32>
    %7 = arith.mulf %5, %6 : vector<1x128xf32>
    %8 = vector.extract_strided_slice %4 {offsets = [1, 0], sizes = [1, 128], strides = [1, 1]} : vector<2x128xf32> to vector<1x128xf32>
    %9 = vector.extract_strided_slice %4 {offsets = [1, 0], sizes = [1, 128], strides = [1, 1]} : vector<2x128xf32> to vector<1x128xf32>
    %10 = arith.mulf %8, %9 : vector<1x128xf32>
    %11 = arith.addf %7, %10 : vector<1x128xf32>
    %cst = arith.constant 2.500000e-01 : f32
    %12 = vector.broadcast %cst : f32 to vector<1x128xf32>
    %13 = arith.cmpf olt, %11, %12 : vector<1x128xf32>
    %cst_4 = arith.constant 9.900000e-01 : f32
    %cst_5 = arith.constant 0.00999999977 : f32
    %14 = vector.broadcast %cst_4 : f32 to vector<1x128xf32>
    %15 = vector.broadcast %cst_5 : f32 to vector<1x128xf32>
    %16 = arith.select %13, %14, %15 : vector<1x128xi1>, vector<1x128xf32>
    %c0_6 = arith.constant 0 : index
    %c0_7 = arith.constant 0 : index
    %17 = vector.load %arg2[%c0_6, %c0_7] : memref<32x128xf32, #tpu.memory_space<vmem>>, vector<1x128xf32>
    tpu.vector_store %arg2[%c0_6, %c0_7], %16 {strides = array<i32>} : memref<32x128xf32, #tpu.memory_space<vmem>>, vector<1x128xf32>,
    %c0_8 = arith.constant 0 : index
    %c0_9 = arith.constant 0 : index
    %c0_10 = arith.constant 0 : index
    %18 = vector.load %arg1[%c0_8, %c0_9, %c0_10] : memref<4x8x128xf32, #tpu.memory_space<vmem>>, vector<1x2x128xf32>
    %19 = vector.shape_cast %18 : vector<1x2x128xf32> to vector<2x128xf32>
    %c2 = arith.constant 2 : index
    %c0_11 = arith.constant 0 : index
    %c0_12 = arith.constant 0 : index
    %20 = vector.load %arg1[%c2, %c0_11, %c0_12] : memref<4x8x128xf32, #tpu.memory_space<vmem>>, vector<1x2x128xf32>
    %21 = vector.shape_cast %20 : vector<1x2x128xf32> to vector<2x128xf32>
    %22 = arith.subf %19, %21 : vector<2x128xf32>
    %23 = vector.extract_strided_slice %22 {offsets = [0, 0], sizes = [1, 128], strides = [1, 1]} : vector<2x128xf32> to vector<1x128xf32>
    %24 = vector.extract_strided_slice %22 {offsets = [0, 0], sizes = [1, 128], strides = [1, 1]} : vector<2x128xf32> to vector<1x128xf32>
    %25 = arith.mulf %23, %24 : vector<1x128xf32>
    %26 = vector.extract_strided_slice %22 {offsets = [1, 0], sizes = [1, 128], strides = [1, 1]} : vector<2x128xf32> to vector<1x128xf32>
    %27 = vector.extract_strided_slice %22 {offsets = [1, 0], sizes = [1, 128], strides = [1, 1]} : vector<2x128xf32> to vector<1x128xf32>
    %28 = arith.mulf %26, %27 : vector<1x128xf32>
    %29 = arith.addf %25, %28 : vector<1x128xf32>
    %cst_13 = arith.constant 2.500000e-01 : f32
    %30 = vector.broadcast %cst_13 : f32 to vector<1x128xf32>
    %31 = arith.cmpf olt, %29, %30 : vector<1x128xf32>
    %cst_14 = arith.constant 9.900000e-01 : f32
    %cst_15 = arith.constant 0.00999999977 : f32
    %32 = vector.broadcast %cst_14 : f32 to vector<1x128xf32>
    %33 = vector.broadcast %cst_15 : f32 to vector<1x128xf32>
    %34 = arith.select %31, %32, %33 : vector<1x128xi1>, vector<1x128xf32>
    %c1_16 = arith.constant 1 : index
    %c0_17 = arith.constant 0 : index
    %35 = vector.load %arg2[%c1_16, %c0_17] : memref<32x128xf32, #tpu.memory_space<vmem>>, vector<1x128xf32>
    tpu.vector_store %arg2[%c1_16, %c0_17], %34 {strides = array<i32>} : memref<32x128xf32, #tpu.memory_space<vmem>>, vector<1x128xf32>,
    %c0_18 = arith.constant 0 : index
    %c0_19 = arith.constant 0 : index
    %c0_20 = arith.constant 0 : index
    %36 = vector.load %arg1[%c0_18, %c0_19, %c0_20] : memref<4x8x128xf32, #tpu.memory_space<vmem>>, vector<1x2x128xf32>
    %37 = vector.shape_cast %36 : vector<1x2x128xf32> to vector<2x128xf32>
    %c3 = arith.constant 3 : index
    %c0_21 = arith.constant 0 : index
    %c0_22 = arith.constant 0 : index
    %38 = vector.load %arg1[%c3, %c0_21, %c0_22] : memref<4x8x128xf32, #tpu.memory_space<vmem>>, vector<1x2x128xf32>
    %39 = vector.shape_cast %38 : vector<1x2x128xf32> to vector<2x128xf32>
    %40 = arith.subf %37, %39 : vector<2x128xf32>
    %41 = vector.extract_strided_slice %40 {offsets = [0, 0], sizes = [1, 128], strides = [1, 1]} : vector<2x128xf32> to vector<1x128xf32>
    %42 = vector.extract_strided_slice %40 {offsets = [0, 0], sizes = [1, 128], strides = [1, 1]} : vector<2x128xf32> to vector<1x128xf32>
    %43 = arith.mulf %41, %42 : vector<1x128xf32>
    %44 = vector.extract_strided_slice %40 {offsets = [1, 0], sizes = [1, 128], strides = [1, 1]} : vector<2x128xf32> to vector<1x128xf32>
    %45 = vector.extract_strided_slice %40 {offsets = [1, 0], sizes = [1, 128], strides = [1, 1]} : vector<2x128xf32> to vector<1x128xf32>
    %46 = arith.mulf %44, %45 : vector<1x128xf32>
    %47 = arith.addf %43, %46 : vector<1x128xf32>
    %cst_23 = arith.constant 2.500000e-01 : f32
    %48 = vector.broadcast %cst_23 : f32 to vector<1x128xf32>
    %49 = arith.cmpf olt, %47, %48 : vector<1x128xf32>
    %cst_24 = arith.constant 9.900000e-01 : f32
    %cst_25 = arith.constant 0.00999999977 : f32
    %50 = vector.broadcast %cst_24 : f32 to vector<1x128xf32>
    %51 = vector.broadcast %cst_25 : f32 to vector<1x128xf32>
    %52 = arith.select %49, %50, %51 : vector<1x128xi1>, vector<1x128xf32>
    %c2_26 = arith.constant 2 : index
    %c0_27 = arith.constant 0 : index
    %53 = vector.load %arg2[%c2_26, %c0_27] : memref<32x128xf32, #tpu.memory_space<vmem>>, vector<1x128xf32>
    tpu.vector_store %arg2[%c2_26, %c0_27], %52 {strides = array<i32>} : memref<32x128xf32, #tpu.memory_space<vmem>>, vector<1x128xf32>,
    %c3_28 = arith.constant 3 : index
    %c0_29 = arith.constant 0 : index
    %54 = vector.load %arg2[%c3_28, %c0_29] : memref<32x128xf32, #tpu.memory_space<vmem>>, vector<1x128xf32>
    tpu.vector_store %arg2[%c3_28, %c0_29], %16 {strides = array<i32>} : memref<32x128xf32, #tpu.memory_space<vmem>>, vector<1x128xf32>,
    %c1_30 = arith.constant 1 : index
    %c0_31 = arith.constant 0 : index
    %c0_32 = arith.constant 0 : index
    %55 = vector.load %arg1[%c1_30, %c0_31, %c0_32] : memref<4x8x128xf32, #tpu.memory_space<vmem>>, vector<1x2x128xf32>
    %56 = vector.shape_cast %55 : vector<1x2x128xf32> to vector<2x128xf32>
    %c2_33 = arith.constant 2 : index
    %c0_34 = arith.constant 0 : index
    %c0_35 = arith.constant 0 : index
    %57 = vector.load %arg1[%c2_33, %c0_34, %c0_35] : memref<4x8x128xf32, #tpu.memory_space<vmem>>, vector<1x2x128xf32>
    %58 = vector.shape_cast %57 : vector<1x2x128xf32> to vector<2x128xf32>
    %59 = arith.subf %56, %58 : vector<2x128xf32>
    %60 = vector.extract_strided_slice %59 {offsets = [0, 0], sizes = [1, 128], strides = [1, 1]} : vector<2x128xf32> to vector<1x128xf32>
    %61 = vector.extract_strided_slice %59 {offsets = [0, 0], sizes = [1, 128], strides = [1, 1]} : vector<2x128xf32> to vector<1x128xf32>
    %62 = arith.mulf %60, %61 : vector<1x128xf32>
    %63 = vector.extract_strided_slice %59 {offsets = [1, 0], sizes = [1, 128], strides = [1, 1]} : vector<2x128xf32> to vector<1x128xf32>
    %64 = vector.extract_strided_slice %59 {offsets = [1, 0], sizes = [1, 128], strides = [1, 1]} : vector<2x128xf32> to vector<1x128xf32>
    %65 = arith.mulf %63, %64 : vector<1x128xf32>
    %66 = arith.addf %62, %65 : vector<1x128xf32>
    %cst_36 = arith.constant 2.500000e-01 : f32
    %67 = vector.broadcast %cst_36 : f32 to vector<1x128xf32>
    %68 = arith.cmpf olt, %66, %67 : vector<1x128xf32>
    %cst_37 = arith.constant 9.900000e-01 : f32
    %cst_38 = arith.constant 0.00999999977 : f32
    %69 = vector.broadcast %cst_37 : f32 to vector<1x128xf32>
    %70 = vector.broadcast %cst_38 : f32 to vector<1x128xf32>
    %71 = arith.select %68, %69, %70 : vector<1x128xi1>, vector<1x128xf32>
    %c4 = arith.constant 4 : index
    %c0_39 = arith.constant 0 : index
    %72 = vector.load %arg2[%c4, %c0_39] : memref<32x128xf32, #tpu.memory_space<vmem>>, vector<1x128xf32>
    tpu.vector_store %arg2[%c4, %c0_39], %71 {strides = array<i32>} : memref<32x128xf32, #tpu.memory_space<vmem>>, vector<1x128xf32>,
    %c1_40 = arith.constant 1 : index
    %c0_41 = arith.constant 0 : index
    %c0_42 = arith.constant 0 : index
    %73 = vector.load %arg1[%c1_40, %c0_41, %c0_42] : memref<4x8x128xf32, #tpu.memory_space<vmem>>, vector<1x2x128xf32>
    %74 = vector.shape_cast %73 : vector<1x2x128xf32> to vector<2x128xf32>
    %c3_43 = arith.constant 3 : index
    %c0_44 = arith.constant 0 : index
    %c0_45 = arith.constant 0 : index
    %75 = vector.load %arg1[%c3_43, %c0_44, %c0_45] : memref<4x8x128xf32, #tpu.memory_space<vmem>>, vector<1x2x128xf32>
    %76 = vector.shape_cast %75 : vector<1x2x128xf32> to vector<2x128xf32>
    %77 = arith.subf %74, %76 : vector<2x128xf32>
    %78 = vector.extract_strided_slice %77 {offsets = [0, 0], sizes = [1, 128], strides = [1, 1]} : vector<2x128xf32> to vector<1x128xf32>
    %79 = vector.extract_strided_slice %77 {offsets = [0, 0], sizes = [1, 128], strides = [1, 1]} : vector<2x128xf32> to vector<1x128xf32>
    %80 = arith.mulf %78, %79 : vector<1x128xf32>
    %81 = vector.extract_strided_slice %77 {offsets = [1, 0], sizes = [1, 128], strides = [1, 1]} : vector<2x128xf32> to vector<1x128xf32>
    %82 = vector.extract_strided_slice %77 {offsets = [1, 0], sizes = [1, 128], strides = [1, 1]} : vector<2x128xf32> to vector<1x128xf32>
    %83 = arith.mulf %81, %82 : vector<1x128xf32>
    %84 = arith.addf %80, %83 : vector<1x128xf32>
    %cst_46 = arith.constant 2.500000e-01 : f32
    %85 = vector.broadcast %cst_46 : f32 to vector<1x128xf32>
    %86 = arith.cmpf olt, %84, %85 : vector<1x128xf32>
    %cst_47 = arith.constant 9.900000e-01 : f32
    %cst_48 = arith.constant 0.00999999977 : f32
    %87 = vector.broadcast %cst_47 : f32 to vector<1x128xf32>
    %88 = vector.broadcast %cst_48 : f32 to vector<1x128xf32>
    %89 = arith.select %86, %87, %88 : vector<1x128xi1>, vector<1x128xf32>
    %c5 = arith.constant 5 : index
    %c0_49 = arith.constant 0 : index
    %90 = vector.load %arg2[%c5, %c0_49] : memref<32x128xf32, #tpu.memory_space<vmem>>, vector<1x128xf32>
    tpu.vector_store %arg2[%c5, %c0_49], %89 {strides = array<i32>} : memref<32x128xf32, #tpu.memory_space<vmem>>, vector<1x128xf32>,
    %c6 = arith.constant 6 : index
    %c0_50 = arith.constant 0 : index
    %91 = vector.load %arg2[%c6, %c0_50] : memref<32x128xf32, #tpu.memory_space<vmem>>, vector<1x128xf32>
    tpu.vector_store %arg2[%c6, %c0_50], %34 {strides = array<i32>} : memref<32x128xf32, #tpu.memory_space<vmem>>, vector<1x128xf32>,
    %c7 = arith.constant 7 : index
    %c0_51 = arith.constant 0 : index
    %92 = vector.load %arg2[%c7, %c0_51] : memref<32x128xf32, #tpu.memory_space<vmem>>, vector<1x128xf32>
    tpu.vector_store %arg2[%c7, %c0_51], %71 {strides = array<i32>} : memref<32x128xf32, #tpu.memory_space<vmem>>, vector<1x128xf32>,
    %c2_52 = arith.constant 2 : index
    %c0_53 = arith.constant 0 : index
    %c0_54 = arith.constant 0 : index
    %93 = vector.load %arg1[%c2_52, %c0_53, %c0_54] : memref<4x8x128xf32, #tpu.memory_space<vmem>>, vector<1x2x128xf32>
    %94 = vector.shape_cast %93 : vector<1x2x128xf32> to vector<2x128xf32>
    %c3_55 = arith.constant 3 : index
    %c0_56 = arith.constant 0 : index
    %c0_57 = arith.constant 0 : index
    %95 = vector.load %arg1[%c3_55, %c0_56, %c0_57] : memref<4x8x128xf32, #tpu.memory_space<vmem>>, vector<1x2x128xf32>
    %96 = vector.shape_cast %95 : vector<1x2x128xf32> to vector<2x128xf32>
    %97 = arith.subf %94, %96 : vector<2x128xf32>
    %98 = vector.extract_strided_slice %97 {offsets = [0, 0], sizes = [1, 128], strides = [1, 1]} : vector<2x128xf32> to vector<1x128xf32>
    %99 = vector.extract_strided_slice %97 {offsets = [0, 0], sizes = [1, 128], strides = [1, 1]} : vector<2x128xf32> to vector<1x128xf32>
    %100 = arith.mulf %98, %99 : vector<1x128xf32>
    %101 = vector.extract_strided_slice %97 {offsets = [1, 0], sizes = [1, 128], strides = [1, 1]} : vector<2x128xf32> to vector<1x128xf32>
    %102 = vector.extract_strided_slice %97 {offsets = [1, 0], sizes = [1, 128], strides = [1, 1]} : vector<2x128xf32> to vector<1x128xf32>
    %103 = arith.mulf %101, %102 : vector<1x128xf32>
    %104 = arith.addf %100, %103 : vector<1x128xf32>
    %cst_58 = arith.constant 2.500000e-01 : f32
    %105 = vector.broadcast %cst_58 : f32 to vector<1x128xf32>
    %106 = arith.cmpf olt, %104, %105 : vector<1x128xf32>
    %cst_59 = arith.constant 9.900000e-01 : f32
    %cst_60 = arith.constant 0.00999999977 : f32
    %107 = vector.broadcast %cst_59 : f32 to vector<1x128xf32>
    %108 = vector.broadcast %cst_60 : f32 to vector<1x128xf32>
    %109 = arith.select %106, %107, %108 : vector<1x128xi1>, vector<1x128xf32>
    %c8 = arith.constant 8 : index
    %c0_61 = arith.constant 0 : index
    %110 = vector.load %arg2[%c8, %c0_61] : memref<32x128xf32, #tpu.memory_space<vmem>>, vector<1x128xf32>
    tpu.vector_store %arg2[%c8, %c0_61], %109 {strides = array<i32>} : memref<32x128xf32, #tpu.memory_space<vmem>>, vector<1x128xf32>,
    %c9 = arith.constant 9 : index
    %c0_62 = arith.constant 0 : index
    %111 = vector.load %arg2[%c9, %c0_62] : memref<32x128xf32, #tpu.memory_space<vmem>>, vector<1x128xf32>
    tpu.vector_store %arg2[%c9, %c0_62], %52 {strides = array<i32>} : memref<32x128xf32, #tpu.memory_space<vmem>>, vector<1x128xf32>,
    %c10 = arith.constant 10 : index
    %c0_63 = arith.constant 0 : index
    %112 = vector.load %arg2[%c10, %c0_63] : memref<32x128xf32, #tpu.memory_space<vmem>>, vector<1x128xf32>
    tpu.vector_store %arg2[%c10, %c0_63], %89 {strides = array<i32>} : memref<32x128xf32, #tpu.memory_space<vmem>>, vector<1x128xf32>,
    %c11 = arith.constant 11 : index
    %c0_64 = arith.constant 0 : index
    %113 = vector.load %arg2[%c11, %c0_64] : memref<32x128xf32, #tpu.memory_space<vmem>>, vector<1x128xf32>
    tpu.vector_store %arg2[%c11, %c0_64], %109 {strides = array<i32>} : memref<32x128xf32, #tpu.memory_space<vmem>>, vector<1x128xf32>,
    %c0_65 = arith.constant 0 : index
    %c4_66 = arith.constant 4 : index
    %c0_67 = arith.constant 0 : index
    %114 = vector.load %arg1[%c0_65, %c4_66, %c0_67] : memref<4x8x128xf32, #tpu.memory_space<vmem>>, vector<1x1x128xf32>
    %115 = vector.shape_cast %114 : vector<1x1x128xf32> to vector<1x128xf32>
    %c12 = arith.constant 12 : index
    %c0_68 = arith.constant 0 : index
    %116 = vector.load %arg2[%c12, %c0_68] : memref<32x128xf32, #tpu.memory_space<vmem>>, vector<1x128xf32>
    tpu.vector_store %arg2[%c12, %c0_68], %115 {strides = array<i32>} : memref<32x128xf32, #tpu.memory_space<vmem>>, vector<1x128xf32>,
    %c0_69 = arith.constant 0 : index
    %c5_70 = arith.constant 5 : index
    %c0_71 = arith.constant 0 : index
    %117 = vector.load %arg1[%c0_69, %c5_70, %c0_71] : memref<4x8x128xf32, #tpu.memory_space<vmem>>, vector<1x1x128xf32>
    %118 = vector.shape_cast %117 : vector<1x1x128xf32> to vector<1x128xf32>
    %c13 = arith.constant 13 : index
    %c0_72 = arith.constant 0 : index
    %119 = vector.load %arg2[%c13, %c0_72] : memref<32x128xf32, #tpu.memory_space<vmem>>, vector<1x128xf32>
    tpu.vector_store %arg2[%c13, %c0_72], %118 {strides = array<i32>} : memref<32x128xf32, #tpu.memory_space<vmem>>, vector<1x128xf32>,
    %c0_73 = arith.constant 0 : index
    %c6_74 = arith.constant 6 : index
    %c0_75 = arith.constant 0 : index
    %120 = vector.load %arg1[%c0_73, %c6_74, %c0_75] : memref<4x8x128xf32, #tpu.memory_space<vmem>>, vector<1x1x128xf32>
    %121 = vector.shape_cast %120 : vector<1x1x128xf32> to vector<1x128xf32>
    %c14 = arith.constant 14 : index
    %c0_76 = arith.constant 0 : index
    %122 = vector.load %arg2[%c14, %c0_76] : memref<32x128xf32, #tpu.memory_space<vmem>>, vector<1x128xf32>
    tpu.vector_store %arg2[%c14, %c0_76], %121 {strides = array<i32>} : memref<32x128xf32, #tpu.memory_space<vmem>>, vector<1x128xf32>,
    %c0_77 = arith.constant 0 : index
    %c7_78 = arith.constant 7 : index
    %c0_79 = arith.constant 0 : index
    %123 = vector.load %arg1[%c0_77, %c7_78, %c0_79] : memref<4x8x128xf32, #tpu.memory_space<vmem>>, vector<1x1x128xf32>
    %124 = vector.shape_cast %123 : vector<1x1x128xf32> to vector<1x128xf32>
    %c15 = arith.constant 15 : index
    %c0_80 = arith.constant 0 : index
    %125 = vector.load %arg2[%c15, %c0_80] : memref<32x128xf32, #tpu.memory_space<vmem>>, vector<1x128xf32>
    tpu.vector_store %arg2[%c15, %c0_80], %124 {strides = array<i32>} : memref<32x128xf32, #tpu.memory_space<vmem>>, vector<1x128xf32>,
    %c1_81 = arith.constant 1 : index
    %c4_82 = arith.constant 4 : index
    %c0_83 = arith.constant 0 : index
    %126 = vector.load %arg1[%c1_81, %c4_82, %c0_83] : memref<4x8x128xf32, #tpu.memory_space<vmem>>, vector<1x1x128xf32>
    %127 = vector.shape_cast %126 : vector<1x1x128xf32> to vector<1x128xf32>
    %c16 = arith.constant 16 : index
    %c0_84 = arith.constant 0 : index
    %128 = vector.load %arg2[%c16, %c0_84] : memref<32x128xf32, #tpu.memory_space<vmem>>, vector<1x128xf32>
    tpu.vector_store %arg2[%c16, %c0_84], %127 {strides = array<i32>} : memref<32x128xf32, #tpu.memory_space<vmem>>, vector<1x128xf32>,
    %c1_85 = arith.constant 1 : index
    %c5_86 = arith.constant 5 : index
    %c0_87 = arith.constant 0 : index
    %129 = vector.load %arg1[%c1_85, %c5_86, %c0_87] : memref<4x8x128xf32, #tpu.memory_space<vmem>>, vector<1x1x128xf32>
    %130 = vector.shape_cast %129 : vector<1x1x128xf32> to vector<1x128xf32>
    %c17 = arith.constant 17 : index
    %c0_88 = arith.constant 0 : index
    %131 = vector.load %arg2[%c17, %c0_88] : memref<32x128xf32, #tpu.memory_space<vmem>>, vector<1x128xf32>
    tpu.vector_store %arg2[%c17, %c0_88], %130 {strides = array<i32>} : memref<32x128xf32, #tpu.memory_space<vmem>>, vector<1x128xf32>,
    %c1_89 = arith.constant 1 : index
    %c6_90 = arith.constant 6 : index
    %c0_91 = arith.constant 0 : index
    %132 = vector.load %arg1[%c1_89, %c6_90, %c0_91] : memref<4x8x128xf32, #tpu.memory_space<vmem>>, vector<1x1x128xf32>
    %133 = vector.shape_cast %132 : vector<1x1x128xf32> to vector<1x128xf32>
    %c18 = arith.constant 18 : index
    %c0_92 = arith.constant 0 : index
    %134 = vector.load %arg2[%c18, %c0_92] : memref<32x128xf32, #tpu.memory_space<vmem>>, vector<1x128xf32>
    tpu.vector_store %arg2[%c18, %c0_92], %133 {strides = array<i32>} : memref<32x128xf32, #tpu.memory_space<vmem>>, vector<1x128xf32>,
    %c1_93 = arith.constant 1 : index
    %c7_94 = arith.constant 7 : index
    %c0_95 = arith.constant 0 : index
    %135 = vector.load %arg1[%c1_93, %c7_94, %c0_95] : memref<4x8x128xf32, #tpu.memory_space<vmem>>, vector<1x1x128xf32>
    %136 = vector.shape_cast %135 : vector<1x1x128xf32> to vector<1x128xf32>
    %c19 = arith.constant 19 : index
    %c0_96 = arith.constant 0 : index
    %137 = vector.load %arg2[%c19, %c0_96] : memref<32x128xf32, #tpu.memory_space<vmem>>, vector<1x128xf32>
    tpu.vector_store %arg2[%c19, %c0_96], %136 {strides = array<i32>} : memref<32x128xf32, #tpu.memory_space<vmem>>, vector<1x128xf32>,
    %c2_97 = arith.constant 2 : index
    %c4_98 = arith.constant 4 : index
    %c0_99 = arith.constant 0 : index
    %138 = vector.load %arg1[%c2_97, %c4_98, %c0_99] : memref<4x8x128xf32, #tpu.memory_space<vmem>>, vector<1x1x128xf32>
    %139 = vector.shape_cast %138 : vector<1x1x128xf32> to vector<1x128xf32>
    %c20 = arith.constant 20 : index
    %c0_100 = arith.constant 0 : index
    %140 = vector.load %arg2[%c20, %c0_100] : memref<32x128xf32, #tpu.memory_space<vmem>>, vector<1x128xf32>
    tpu.vector_store %arg2[%c20, %c0_100], %139 {strides = array<i32>} : memref<32x128xf32, #tpu.memory_space<vmem>>, vector<1x128xf32>,
    %c2_101 = arith.constant 2 : index
    %c5_102 = arith.constant 5 : index
    %c0_103 = arith.constant 0 : index
    %141 = vector.load %arg1[%c2_101, %c5_102, %c0_103] : memref<4x8x128xf32, #tpu.memory_space<vmem>>, vector<1x1x128xf32>
    %142 = vector.shape_cast %141 : vector<1x1x128xf32> to vector<1x128xf32>
    %c21 = arith.constant 21 : index
    %c0_104 = arith.constant 0 : index
    %143 = vector.load %arg2[%c21, %c0_104] : memref<32x128xf32, #tpu.memory_space<vmem>>, vector<1x128xf32>
    tpu.vector_store %arg2[%c21, %c0_104], %142 {strides = array<i32>} : memref<32x128xf32, #tpu.memory_space<vmem>>, vector<1x128xf32>,
    %c2_105 = arith.constant 2 : index
    %c6_106 = arith.constant 6 : index
    %c0_107 = arith.constant 0 : index
    %144 = vector.load %arg1[%c2_105, %c6_106, %c0_107] : memref<4x8x128xf32, #tpu.memory_space<vmem>>, vector<1x1x128xf32>
    %145 = vector.shape_cast %144 : vector<1x1x128xf32> to vector<1x128xf32>
    %c22 = arith.constant 22 : index
    %c0_108 = arith.constant 0 : index
    %146 = vector.load %arg2[%c22, %c0_108] : memref<32x128xf32, #tpu.memory_space<vmem>>, vector<1x128xf32>
    tpu.vector_store %arg2[%c22, %c0_108], %145 {strides = array<i32>} : memref<32x128xf32, #tpu.memory_space<vmem>>, vector<1x128xf32>,
    %c2_109 = arith.constant 2 : index
    %c7_110 = arith.constant 7 : index
    %c0_111 = arith.constant 0 : index
    %147 = vector.load %arg1[%c2_109, %c7_110, %c0_111] : memref<4x8x128xf32, #tpu.memory_space<vmem>>, vector<1x1x128xf32>
    %148 = vector.shape_cast %147 : vector<1x1x128xf32> to vector<1x128xf32>
    %c23 = arith.constant 23 : index
    %c0_112 = arith.constant 0 : index
    %149 = vector.load %arg2[%c23, %c0_112] : memref<32x128xf32, #tpu.memory_space<vmem>>, vector<1x128xf32>
    tpu.vector_store %arg2[%c23, %c0_112], %148 {strides = array<i32>} : memref<32x128xf32, #tpu.memory_space<vmem>>, vector<1x128xf32>,
    %c3_113 = arith.constant 3 : index
    %c4_114 = arith.constant 4 : index
    %c0_115 = arith.constant 0 : index
    %150 = vector.load %arg1[%c3_113, %c4_114, %c0_115] : memref<4x8x128xf32, #tpu.memory_space<vmem>>, vector<1x1x128xf32>
    %151 = vector.shape_cast %150 : vector<1x1x128xf32> to vector<1x128xf32>
    %c24 = arith.constant 24 : index
    %c0_116 = arith.constant 0 : index
    %152 = vector.load %arg2[%c24, %c0_116] : memref<32x128xf32, #tpu.memory_space<vmem>>, vector<1x128xf32>
    tpu.vector_store %arg2[%c24, %c0_116], %151 {strides = array<i32>} : memref<32x128xf32, #tpu.memory_space<vmem>>, vector<1x128xf32>,
    %c3_117 = arith.constant 3 : index
    %c5_118 = arith.constant 5 : index
    %c0_119 = arith.constant 0 : index
    %153 = vector.load %arg1[%c3_117, %c5_118, %c0_119] : memref<4x8x128xf32, #tpu.memory_space<vmem>>, vector<1x1x128xf32>
    %154 = vector.shape_cast %153 : vector<1x1x128xf32> to vector<1x128xf32>
    %c25 = arith.constant 25 : index
    %c0_120 = arith.constant 0 : index
    %155 = vector.load %arg2[%c25, %c0_120] : memref<32x128xf32, #tpu.memory_space<vmem>>, vector<1x128xf32>
    tpu.vector_store %arg2[%c25, %c0_120], %154 {strides = array<i32>} : memref<32x128xf32, #tpu.memory_space<vmem>>, vector<1x128xf32>,
    %c3_121 = arith.constant 3 : index
    %c6_122 = arith.constant 6 : index
    %c0_123 = arith.constant 0 : index
    %156 = vector.load %arg1[%c3_121, %c6_122, %c0_123] : memref<4x8x128xf32, #tpu.memory_space<vmem>>, vector<1x1x128xf32>
    %157 = vector.shape_cast %156 : vector<1x1x128xf32> to vector<1x128xf32>
    %c26 = arith.constant 26 : index
    %c0_124 = arith.constant 0 : index
    %158 = vector.load %arg2[%c26, %c0_124] : memref<32x128xf32, #tpu.memory_space<vmem>>, vector<1x128xf32>
    tpu.vector_store %arg2[%c26, %c0_124], %157 {strides = array<i32>} : memref<32x128xf32, #tpu.memory_space<vmem>>, vector<1x128xf32>,
    %c3_125 = arith.constant 3 : index
    %c7_126 = arith.constant 7 : index
    %c0_127 = arith.constant 0 : index
    %159 = vector.load %arg1[%c3_125, %c7_126, %c0_127] : memref<4x8x128xf32, #tpu.memory_space<vmem>>, vector<1x1x128xf32>
    %160 = vector.shape_cast %159 : vector<1x1x128xf32> to vector<1x128xf32>
    %c27 = arith.constant 27 : index
    %c0_128 = arith.constant 0 : index
    %161 = vector.load %arg2[%c27, %c0_128] : memref<32x128xf32, #tpu.memory_space<vmem>>, vector<1x128xf32>
    tpu.vector_store %arg2[%c27, %c0_128], %160 {strides = array<i32>} : memref<32x128xf32, #tpu.memory_space<vmem>>, vector<1x128xf32>,
    %cst_129 = arith.constant 0.000000e+00 : f32
    %162 = vector.broadcast %cst_129 : f32 to vector<4x128xf32>
    %c28 = arith.constant 28 : index
    %c0_130 = arith.constant 0 : index
    %163 = vector.load %arg2[%c28, %c0_130] : memref<32x128xf32, #tpu.memory_space<vmem>>, vector<4x128xf32>
    tpu.vector_store %arg2[%c28, %c0_130], %162 {strides = array<i32>} : memref<32x128xf32, #tpu.memory_space<vmem>>, vector<4x128xf32>,
    return
  }
  func.func @transform_0(%arg0: i32) -> (i32, i32, i32) {
    %c0_i32 = arith.constant 0 : i32
    %c0_i32_0 = arith.constant 0 : i32
    %c0_i32_1 = arith.constant 0 : i32
    return %c0_i32, %c0_i32_0, %arg0 : i32, i32, i32
  }
  func.func @transform_1(%arg0: i32) -> (i32, i32) {
    %c0_i32 = arith.constant 0 : i32
    %c0_i32_0 = arith.constant 0 : i32
    return %c0_i32, %arg0 : i32, i32
  }
}

</mosaic_0001>

<bundles_post_ra>
// kernel: fwd.1
= control target key start
LH: loop header
LB: loop body
LE: loop exit
PB: predicated region body
PF: predicated region fallthrough
CT: control target
= control target key end

     0   :  { %v143_v38 = vmov 0.0   ;;  %v144_v39 = vmov 0.01   ;;  %s254_s0 = inlined_call_operand.vmem [shape: f32[4,8,128], index: 0, kind: input, shape index: {}]   ;;  %s255_s1 = inlined_call_operand.vmem [shape: f32[32,128], index: 1, kind: output, shape index: {}]  }
   0x1   :  { %v8_v0 = vld [vmem:[%s254_s0] sm:$0x3]  ;;  %v120_v1 = vld [vmem:[%s254_s0 + $0x8] sm:$0x3]  ;;  %v121_v4 = vld [vmem:[%s254_s0 + $0x10] sm:$0x3] }
   0x2   :  { %v20_v2 = vld [vmem:[%s254_s0] sm:$0x3]  ;;  %v11_v3 = vsub.f32 %v8_v0, %v120_v1  ;;  %v122_v6 = vld [vmem:[%s254_s0 + $0x18] sm:$0x3]  ;;  %v123_v9 = vld [vmem:[%s254_s0 + $0x8] sm:$0x3] }
   0x3   :  { %v32_v5 = vld [vmem:[%s254_s0] sm:$0x3]  ;;  %v23_v7 = vsub.f32 %v20_v2, %v121_v4  ;;  %v124_v10 = vld [vmem:[%s254_s0 + $0x10] sm:$0x3]  ;;  %v125_v11 = vld [vmem:[%s254_s0 + $0x8] sm:$0x3] }
   0x4   :  { %v35_v8 = vsub.f32 %v32_v5, %v122_v6  ;;  %v12_v12 = vmul.f32 %v11_v3, %v11_v3  ;;  %v47_v13 = vsub.f32 %v123_v9, %v124_v10  ;;  %v126_v14 = vld [vmem:[%s254_s0 + $0x18] sm:$0x3]  ;;  %v127_v15 = vld [vmem:[%s254_s0 + $0x10] sm:$0x3]  ;;  %v83_v21 = vld [vmem:[%s254_s0 + $0x4] sm:$0xf]  }
   0x5   :  { %v128_v16 = vld [vmem:[%s254_s0 + $0x18] sm:$0x3]  ;;  %v24_v17 = vmul.f32 %v23_v7, %v23_v7  ;;  %v58_v19 = vsub.f32 %v125_v11, %v126_v14  ;;  %v129_v22 = vld [vmem:[%s254_s0 + $0xc] sm:$0xf]   ;;  %v133_v23 = vld [vmem:[%s254_s0 + $0x14] sm:$0xf]  }
   0x6   :  { %v36_v18 = vmul.f32 %v35_v8, %v35_v8  ;;  %v71_v20 = vsub.f32 %v127_v15, %v128_v16  ;;  %v14_v24 = vrot.slane %v12_v12, 1  ;;  %v48_v25 = vmul.f32 %v47_v13, %v47_v13  ;;  %84 = vst [vmem:[%s255_s1 + $0xc] sm:$0xf] %v83_v21   ;;  %v137_v26 = vld [vmem:[%s254_s0 + $0x1c] sm:$0xf]  }
   0x7   :  { %v26_v27 = vrot.slane %v24_v17, 1  ;;  %v59_v29 = vmul.f32 %v58_v19, %v58_v19  ;;  %92 = vst [vmem:[%s255_s1 + $0x10] sm:$0xf] %v129_v22  }
   0x8   :  { %v38_v28 = vrot.slane %v36_v18, 1  ;;  %v72_v30 = vmul.f32 %v71_v20, %v71_v20  ;;  %v16_v31 = vadd.f32 %v14_v24, %v12_v12  ;;  %v50_v32 = vrot.slane %v48_v25, 1  ;;  %100 = vst [vmem:[%s255_s1 + $0x14] sm:$0xf] %v133_v23  }
   0x9   :  { %v28_v33 = vadd.f32 %v26_v27, %v24_v17  ;;  %v61_v35 = vrot.slane %v59_v29, 1  ;;  %108 = vst [vmem:[%s255_s1 + $0x18] sm:$0xf] %v137_v26  }
   0xa   :  { %v40_v34 = vadd.f32 %v38_v28, %v36_v18  ;;  %v74_v36 = vrot.slane %v72_v30, 1  ;;  %vm17_vm0 = vcmp.lt.f32.partialorder %v16_v31, 0.25  ;;  %v52_v37 = vadd.f32 %v50_v32, %v48_v25  ;;  %115 = vst [vmem:[%s255_s1 + $0x1c] sm:$0xf] %v143_v38 }
   0xb   :  { %v18_v40 = vsel %vm17_vm0, 0.99, %v144_v39  ;;  %vm29_vm1 = vcmp.lt.f32.partialorder %v28_v33, 0.25  ;;  %v63_v41 = vadd.f32 %v61_v35, %v59_v29 }
   0xc   :  { %vm41_vm2 = vcmp.lt.f32.partialorder %v40_v34, 0.25  ;;  %19 = vst [vmem:[%s255_s1] sm:$0x1] %v18_v40  ;;  %v30_v42 = vsel %vm29_vm1, 0.99, %v144_v39  ;;  %vm53_vm3 = vcmp.lt.f32.partialorder %v52_v37, 0.25  ;;  %v76_v43 = vadd.f32 %v74_v36, %v72_v30 }
   0xd   :  { %44 = vst [vmem:[%s255_s1 + $0x3] sm:$0x1] %v18_v40  ;;  %v42_v44 = vsel %vm41_vm2, 0.99, %v144_v39  ;;  %vm64_vm4 = vcmp.lt.f32.partialorder %v63_v41, 0.25 }
   0xe   :  { %31 = vst [vmem:[%s255_s1 + $0x1] sm:$0x1] %v30_v42  ;;  %v54_v45 = vsel %vm53_vm3, 0.99, %v144_v39  ;;  %vm77_vm5 = vcmp.lt.f32.partialorder %v76_v43, 0.25 }
   0xf   :  { %67 = vst [vmem:[%s255_s1 + $0x6] sm:$0x1] %v30_v42  ;;  %v65_v46 = vsel %vm64_vm4, 0.99, %v144_v39  ;;  %v78_v47 = vsel %vm77_vm5, 0.99, %v144_v39 }
  0x10   :  { %43 = vst [vmem:[%s255_s1 + $0x2] sm:$0x1] %v42_v44 }
  0x11   :  { %80 = vst [vmem:[%s255_s1 + $0x9] sm:$0x1] %v42_v44 }
  0x12   :  { %55 = vst [vmem:[%s255_s1 + $0x4] sm:$0x1] %v54_v45 }
  0x13   :  { %68 = vst [vmem:[%s255_s1 + $0x7] sm:$0x1] %v54_v45 }
  0x14   :  { %66 = vst [vmem:[%s255_s1 + $0x5] sm:$0x1] %v65_v46 }
  0x15   :  { %81 = vst [vmem:[%s255_s1 + $0xa] sm:$0x1] %v65_v46 }
  0x16   :  { %79 = vst [vmem:[%s255_s1 + $0x8] sm:$0x1] %v78_v47 }
  0x17   :  { %82 = vst [vmem:[%s255_s1 + $0xb] sm:$0x1] %v78_v47 }

</bundles_post_ra>
